<compile_context>
chip_gen: v6e
topology: v6e:2x2x1
jax: 0.10.0
libtpu: 0.0.40
codegen_flags: <defaults>
</compile_context>

<pallas_src>
import jax
import jax.numpy as jnp
from jax.experimental import pallas as pl
from jax.experimental.pallas import tpu as pltpu


# ----------------------------- Pallas kernel -------------------------------

def _make_fused_kernel(num_gcn_layers):
    """Fused forward: num_gcn_layers x (GCN + ReLU) -> projection head."""

    def kernel(z0_ref, a_ref, w_ref, b_ref, w2_ref, b2_ref, o_ref):
        h = z0_ref.shape[1]

        a = a_ref[...]            # bf16 A_norm, VMEM-resident, reused by every layer
        zb = z0_ref[...]          # bf16 (N, H) node-type embeddings

        z = None
        for l in range(num_gcn_layers):            # statically unrolled
            zw = jnp.dot(zb, w_ref[l], preferred_element_type=jnp.float32)
            z = jnp.maximum(
                jnp.dot(a, zw.astype(jnp.bfloat16),
                        preferred_element_type=jnp.float32) + b_ref[l],
                0.0)
            zb = z.astype(jnp.bfloat16)

        # projection head: Linear -> ReLU -> Dropout(p=0.0, identity) -> Linear
        h1 = jnp.maximum(
            jnp.dot(zb, w_ref[num_gcn_layers],
                    preferred_element_type=jnp.float32) + b_ref[num_gcn_layers],
            0.0)

        # Lane-dense (N, 128) output slab: projection lands in lanes [H, 2H) via a
        # single K=H matmul against a lane-shifted pw2; z goes into lanes [0, H)
        # directly from the f32 accumulator.
        o = jnp.dot(h1.astype(jnp.bfloat16), w2_ref[...],
                    preferred_element_type=jnp.float32) + b2_ref[...]
        o_ref[...] = o.astype(o_ref.dtype)
        o_ref[:, :h] = z.astype(o_ref.dtype)

    return kernel


# ------------------------------ host wrapper -------------------------------

def custom_conv_forward(x, a_norm, params):
    """Full CustomConv.forward (config above). Returns (z, projection_head(z))."""
    n = a_norm.shape[0]
    h = params["node_type_embed"].shape[1]
    num_layers = len(params["gcn_w"])
    assert num_layers >= 1
    out_w = max(128, ((2 * h + 127) // 128) * 128)   # lane-dense output width

    # node_type_embed(batch.x).squeeze() -- gather in the wrapper (negligible bytes
    # next to A_norm).  NOTE: jnp.take clips out-of-range indices where
    # torch.nn.Embedding would raise.
    idx = x.astype(jnp.int32).reshape(-1)
    z0 = jnp.take(params["node_type_embed"], idx, axis=0)            # (N, H) f32
    # edge_type_embed(batch.x) is computed by the module but unused for
    # cl_model='gcn'; dropped here.

    # bf16 MXU operands; biases stay f32 (elementwise work is f32 in the kernel).
    bf16 = jnp.bfloat16
    z0_b = z0.astype(bf16)
    a_b = a_norm.astype(bf16)
    w_stack = jnp.stack(list(params["gcn_w"]) + [params["pw1"]]).astype(bf16)
    b_stack = jnp.stack(list(params["gcn_b"]) + [params["pb1"]]).astype(jnp.float32)
    w2p = jnp.zeros((h, out_w), bf16).at[:, h:2 * h].set(params["pw2"].astype(bf16))
    b2p = jnp.zeros((1, out_w), jnp.float32).at[:, h:2 * h].set(params["pb2"])

    # Scoped-VMEM budget: single-buffered A + out blocks, double-buffered small
    # operands, intermediates, plus headroom (defaults are only ~16/32 MiB).
    a_bytes = n * n * 2
    out_bytes = n * out_w * 4
    small_ops = 2 * (z0_b.size * 2 + w_stack.size * 2 + b_stack.size * 4
                     + w2p.size * 2 + b2p.size * 4)
    interm = 8 * n * h * 4 + 2 * n * out_w * 4
    vmem_limit = int(min(a_bytes + out_bytes + small_ops + interm + (8 << 20),
                         64 << 20))

    out = pl.pallas_call(
        _make_fused_kernel(num_layers),
        out_shape=jax.ShapeDtypeStruct((n, out_w), jnp.float32),
        grid_spec=pl.GridSpec(
            grid=(1,),
            in_specs=[
                pl.BlockSpec((n, h), lambda i: (0, 0)),                      # z0 (bf16)
                pl.BlockSpec((n, n), lambda i: (0, 0),
                             pipeline_mode=pl.Buffered(1)),                  # A_norm (bf16)
                pl.BlockSpec((num_layers + 1, h, h), lambda i: (0, 0, 0)),   # W stack (bf16)
                pl.BlockSpec((num_layers + 1, 1, h), lambda i: (0, 0, 0)),   # b stack (f32)
                pl.BlockSpec((h, out_w), lambda i: (0, 0)),                  # lane-shifted pw2
                pl.BlockSpec((1, out_w), lambda i: (0, 0)),                  # lane-shifted pb2
            ],
            out_specs=pl.BlockSpec((n, out_w), lambda i: (0, 0),
                                   pipeline_mode=pl.Buffered(1)),
        ),
        compiler_params=pltpu.CompilerParams(
            dimension_semantics=("arbitrary",),
            vmem_limit_bytes=vmem_limit),
    )(z0_b, a_b, w_stack, b_stack, w2p, b2p)

    z = out[:, :h]
    p = out[:, h:2 * h]
    return z, p


custom_conv_forward_jit = jax.jit(custom_conv_forward)


# --------------------------------- driver ----------------------------------

if __name__ == "__main__":
    N, H = 16, 32          # num nodes, cl_hid_dim
    NUM_LAYERS = 2         # cl_gnn_layers
    NUM_EDGES = 24

    keys = iter(jax.random.split(jax.random.PRNGKey(0), 16))

    # batch.x: node-type indices, shape [N, 1] (PyG-style column feature).
    x = jax.random.randint(next(keys), (N, 1), 0, 6)

    # Random undirected edge_index [2, 2*NUM_EDGES].
    src = jax.random.randint(next(keys), (NUM_EDGES,), 0, N)
    dst = jax.random.randint(next(keys), (NUM_EDGES,), 0, N)
    edge_index = jnp.stack(
        [jnp.concatenate([src, dst]), jnp.concatenate([dst, src])]
    )

    # Deterministic parameter init (shapes from the module __init__).
    params = {
        "node_type_embed": 0.1 * jax.random.normal(next(keys), (6, H), jnp.float32),
        "edge_type_embed": 0.1 * jax.random.normal(next(keys), (8, H), jnp.float32),
        "gcn_w": [0.1 * jax.random.normal(next(keys), (H, H), jnp.float32)
                  for _ in range(NUM_LAYERS)],
        "gcn_b": [0.01 * jax.random.normal(next(keys), (1, H), jnp.float32)
                  for _ in range(NUM_LAYERS)],
        "pw1": 0.1 * jax.random.normal(next(keys), (H, H), jnp.float32),
        "pb1": 0.01 * jax.random.normal(next(keys), (1, H), jnp.float32),
        "pw2": 0.1 * jax.random.normal(next(keys), (H, H), jnp.float32),
        "pb2": 0.01 * jax.random.normal(next(keys), (1, H), jnp.float32),
    }

    # Dense symmetric-normalized adjacency == PyG gcn_norm: duplicate edges sum
    # (scatter_add) and self-loops are added only to nodes lacking one.
    adj = jnp.zeros((N, N), jnp.float32).at[edge_index[0], edge_index[1]].add(1.0)
    diag = jnp.diagonal(adj)
    adj = adj + jnp.diag(jnp.where(diag == 0.0, 1.0, 0.0))
    deg = adj.sum(axis=1)
    dis = jnp.where(deg > 0.0, 1.0 / jnp.sqrt(deg), 0.0)
    a_norm = adj * dis[:, None] * dis[None, :]

    z_out, proj_out = custom_conv_forward_jit(x, a_norm, params)
    jax.block_until_ready((z_out, proj_out))
    assert z_out.shape == (N, H) and proj_out.shape == (N, H)

    # Pure-JAX f32 reference for numerical sanity.  Tolerances account for the
    # bf16 MXU inputs used inside the kernel (f32 accumulation).
    z_ref = jnp.take(params["node_type_embed"], x.squeeze(-1), axis=0)
    for w, b in zip(params["gcn_w"], params["gcn_b"]):
        z_ref = jnp.maximum(a_norm @ (z_ref @ w) + b, 0.0)
    h_ref = jnp.maximum(z_ref @ params["pw1"] + params["pb1"], 0.0)
    p_ref = h_ref @ params["pw2"] + params["pb2"]
    assert jnp.allclose(z_out, z_ref, rtol=5e-2, atol=1e-2)
    assert jnp.allclose(proj_out, p_ref, rtol=5e-2, atol=1e-2)

    print("KERNEL_OK")
</pallas_src>

<mosaic_0001>
module attributes {stable_mosaic.version = 11 : i64} {
  func.func @kernel(%arg0: i32, %arg1: memref<16x32xbf16, #tpu.memory_space<vmem>>, %arg2: memref<16x16xbf16, #tpu.memory_space<vmem>>, %arg3: memref<3x32x32xbf16, #tpu.memory_space<vmem>>, %arg4: memref<3x1x32xf32, #tpu.memory_space<vmem>>, %arg5: memref<32x128xbf16, #tpu.memory_space<vmem>>, %arg6: memref<1x128xf32, #tpu.memory_space<vmem>>, %arg7: memref<16x128xf32, #tpu.memory_space<vmem>>) attributes {dimension_semantics = [#tpu.dimension_semantics<arbitrary>], iteration_bounds = array<i64: 1>, scalar_prefetch = 0 : i64, scratch_operands = 0 : i64, tpu.core_type = #tpu.core_type<tc>, window_params = [{pipeline_mode = #tpu.pipeline_mode<synchronous>, transform_indices = @transform_0, window_bounds = array<i64: 16, 32>}, {pipeline_mode = #tpu.pipeline_mode<synchronous>, transform_indices = @transform_1, window_bounds = array<i64: 16, 16>}, {pipeline_mode = #tpu.pipeline_mode<synchronous>, transform_indices = @transform_2, window_bounds = array<i64: 3, 32, 32>}, {pipeline_mode = #tpu.pipeline_mode<synchronous>, transform_indices = @transform_3, window_bounds = array<i64: 3, 1, 32>}, {pipeline_mode = #tpu.pipeline_mode<synchronous>, transform_indices = @transform_4, window_bounds = array<i64: 32, 128>}, {pipeline_mode = #tpu.pipeline_mode<synchronous>, transform_indices = @transform_5, window_bounds = array<i64: 1, 128>}, {pipeline_mode = #tpu.pipeline_mode<synchronous>, transform_indices = @transform_6, window_bounds = array<i64: 16, 128>}]} {
    %c0 = arith.constant 0 : index
    %c0_0 = arith.constant 0 : index
    %0 = vector.load %arg2[%c0, %c0_0] : memref<16x16xbf16, #tpu.memory_space<vmem>>, vector<16x16xbf16>
    %c0_1 = arith.constant 0 : index
    %c0_2 = arith.constant 0 : index
    %1 = vector.load %arg1[%c0_1, %c0_2] : memref<16x32xbf16, #tpu.memory_space<vmem>>, vector<16x32xbf16>
    %c0_3 = arith.constant 0 : index
    %c0_4 = arith.constant 0 : index
    %c0_5 = arith.constant 0 : index
    %2 = vector.load %arg3[%c0_3, %c0_4, %c0_5] : memref<3x32x32xbf16, #tpu.memory_space<vmem>>, vector<1x32x32xbf16>
    %3 = vector.shape_cast %2 : vector<1x32x32xbf16> to vector<32x32xbf16>
    %cst = arith.constant dense<0.000000e+00> : vector<16x32xf32>
    %4 = tpu.matmul %1, %3, %cst {dimension_numbers = #tpu.dot_dimension_numbers<[1], [0], [0], [1], [0, 0, 1, 1], [], []>} : vector<16x32xbf16>, vector<32x32xbf16>, vector<16x32xf32> -> vector<16x32xf32>
    %5 = arith.truncf %4 : vector<16x32xf32> to vector<16x32xbf16>
    %cst_6 = arith.constant dense<0.000000e+00> : vector<16x32xf32>
    %6 = tpu.matmul %0, %5, %cst_6 {dimension_numbers = #tpu.dot_dimension_numbers<[1], [0], [0], [1], [0, 0, 1, 1], [], []>} : vector<16x16xbf16>, vector<16x32xbf16>, vector<16x32xf32> -> vector<16x32xf32>
    %c0_7 = arith.constant 0 : index
    %c0_8 = arith.constant 0 : index
    %c0_9 = arith.constant 0 : index
    %7 = vector.load %arg4[%c0_7, %c0_8, %c0_9] : memref<3x1x32xf32, #tpu.memory_space<vmem>>, vector<1x1x32xf32>
    %8 = vector.shape_cast %7 : vector<1x1x32xf32> to vector<1x32xf32>
    %9 = vector.broadcast %8 : vector<1x32xf32> to vector<16x32xf32>
    %10 = arith.addf %6, %9 : vector<16x32xf32>
    %cst_10 = arith.constant 0.000000e+00 : f32
    %11 = vector.broadcast %cst_10 : f32 to vector<16x32xf32>
    %12 = arith.maximumf %10, %11 : vector<16x32xf32>
    %13 = arith.truncf %12 : vector<16x32xf32> to vector<16x32xbf16>
    %c1 = arith.constant 1 : index
    %c0_11 = arith.constant 0 : index
    %c0_12 = arith.constant 0 : index
    %14 = vector.load %arg3[%c1, %c0_11, %c0_12] : memref<3x32x32xbf16, #tpu.memory_space<vmem>>, vector<1x32x32xbf16>
    %15 = vector.shape_cast %14 : vector<1x32x32xbf16> to vector<32x32xbf16>
    %cst_13 = arith.constant dense<0.000000e+00> : vector<16x32xf32>
    %16 = tpu.matmul %13, %15, %cst_13 {dimension_numbers = #tpu.dot_dimension_numbers<[1], [0], [0], [1], [0, 0, 1, 1], [], []>} : vector<16x32xbf16>, vector<32x32xbf16>, vector<16x32xf32> -> vector<16x32xf32>
    %17 = arith.truncf %16 : vector<16x32xf32> to vector<16x32xbf16>
    %cst_14 = arith.constant dense<0.000000e+00> : vector<16x32xf32>
    %18 = tpu.matmul %0, %17, %cst_14 {dimension_numbers = #tpu.dot_dimension_numbers<[1], [0], [0], [1], [0, 0, 1, 1], [], []>} : vector<16x16xbf16>, vector<16x32xbf16>, vector<16x32xf32> -> vector<16x32xf32>
    %c1_15 = arith.constant 1 : index
    %c0_16 = arith.constant 0 : index
    %c0_17 = arith.constant 0 : index
    %19 = vector.load %arg4[%c1_15, %c0_16, %c0_17] : memref<3x1x32xf32, #tpu.memory_space<vmem>>, vector<1x1x32xf32>
    %20 = vector.shape_cast %19 : vector<1x1x32xf32> to vector<1x32xf32>
    %21 = vector.broadcast %20 : vector<1x32xf32> to vector<16x32xf32>
    %22 = arith.addf %18, %21 : vector<16x32xf32>
    %cst_18 = arith.constant 0.000000e+00 : f32
    %23 = vector.broadcast %cst_18 : f32 to vector<16x32xf32>
    %24 = arith.maximumf %22, %23 : vector<16x32xf32>
    %25 = arith.truncf %24 : vector<16x32xf32> to vector<16x32xbf16>
    %c2 = arith.constant 2 : index
    %c0_19 = arith.constant 0 : index
    %c0_20 = arith.constant 0 : index
    %26 = vector.load %arg3[%c2, %c0_19, %c0_20] : memref<3x32x32xbf16, #tpu.memory_space<vmem>>, vector<1x32x32xbf16>
    %27 = vector.shape_cast %26 : vector<1x32x32xbf16> to vector<32x32xbf16>
    %cst_21 = arith.constant dense<0.000000e+00> : vector<16x32xf32>
    %28 = tpu.matmul %25, %27, %cst_21 {dimension_numbers = #tpu.dot_dimension_numbers<[1], [0], [0], [1], [0, 0, 1, 1], [], []>} : vector<16x32xbf16>, vector<32x32xbf16>, vector<16x32xf32> -> vector<16x32xf32>
    %c2_22 = arith.constant 2 : index
    %c0_23 = arith.constant 0 : index
    %c0_24 = arith.constant 0 : index
    %29 = vector.load %arg4[%c2_22, %c0_23, %c0_24] : memref<3x1x32xf32, #tpu.memory_space<vmem>>, vector<1x1x32xf32>
    %30 = vector.shape_cast %29 : vector<1x1x32xf32> to vector<1x32xf32>
    %31 = vector.broadcast %30 : vector<1x32xf32> to vector<16x32xf32>
    %32 = arith.addf %28, %31 : vector<16x32xf32>
    %cst_25 = arith.constant 0.000000e+00 : f32
    %33 = vector.broadcast %cst_25 : f32 to vector<16x32xf32>
    %34 = arith.maximumf %32, %33 : vector<16x32xf32>
    %35 = arith.truncf %34 : vector<16x32xf32> to vector<16x32xbf16>
    %c0_26 = arith.constant 0 : index
    %c0_27 = arith.constant 0 : index
    %36 = vector.load %arg5[%c0_26, %c0_27] : memref<32x128xbf16, #tpu.memory_space<vmem>>, vector<32x128xbf16>
    %cst_28 = arith.constant dense<0.000000e+00> : vector<16x128xf32>
    %37 = tpu.matmul %35, %36, %cst_28 {dimension_numbers = #tpu.dot_dimension_numbers<[1], [0], [0], [1], [0, 0, 1, 1], [], []>} : vector<16x32xbf16>, vector<32x128xbf16>, vector<16x128xf32> -> vector<16x128xf32>
    %c0_29 = arith.constant 0 : index
    %c0_30 = arith.constant 0 : index
    %38 = vector.load %arg6[%c0_29, %c0_30] : memref<1x128xf32, #tpu.memory_space<vmem>>, vector<1x128xf32>
    %39 = vector.broadcast %38 : vector<1x128xf32> to vector<16x128xf32>
    %40 = arith.addf %37, %39 : vector<16x128xf32>
    %c0_31 = arith.constant 0 : index
    %c0_32 = arith.constant 0 : index
    %41 = vector.load %arg7[%c0_31, %c0_32] : memref<16x128xf32, #tpu.memory_space<vmem>>, vector<16x128xf32>
    tpu.vector_store %arg7[%c0_31, %c0_32], %40 {strides = array<i32>} : memref<16x128xf32, #tpu.memory_space<vmem>>, vector<16x128xf32>,
    %c0_33 = arith.constant 0 : index
    %c0_34 = arith.constant 0 : index
    %42 = vector.load %arg7[%c0_33, %c0_34] : memref<16x128xf32, #tpu.memory_space<vmem>>, vector<16x32xf32>
    tpu.vector_store %arg7[%c0_33, %c0_34], %24 {strides = array<i32>} : memref<16x128xf32, #tpu.memory_space<vmem>>, vector<16x32xf32>,
    return
  }
  func.func @transform_0(%arg0: i32) -> (i32, i32) {
    %c0_i32 = arith.constant 0 : i32
    %c0_i32_0 = arith.constant 0 : i32
    %c0_i32_1 = arith.constant 0 : i32
    return %c0_i32, %c0_i32_0 : i32, i32
  }
  func.func @transform_1(%arg0: i32) -> (i32, i32) {
    %c0_i32 = arith.constant 0 : i32
    %c0_i32_0 = arith.constant 0 : i32
    %c0_i32_1 = arith.constant 0 : i32
    return %c0_i32, %c0_i32_0 : i32, i32
  }
  func.func @transform_2(%arg0: i32) -> (i32, i32, i32) {
    %c0_i32 = arith.constant 0 : i32
    %c0_i32_0 = arith.constant 0 : i32
    %c0_i32_1 = arith.constant 0 : i32
    %c0_i32_2 = arith.constant 0 : i32
    return %c0_i32, %c0_i32_0, %c0_i32_1 : i32, i32, i32
  }
  func.func @transform_3(%arg0: i32) -> (i32, i32, i32) {
    %c0_i32 = arith.constant 0 : i32
    %c0_i32_0 = arith.constant 0 : i32
    %c0_i32_1 = arith.constant 0 : i32
    %c0_i32_2 = arith.constant 0 : i32
    return %c0_i32, %c0_i32_0, %c0_i32_1 : i32, i32, i32
  }
  func.func @transform_4(%arg0: i32) -> (i32, i32) {
    %c0_i32 = arith.constant 0 : i32
    %c0_i32_0 = arith.constant 0 : i32
    %c0_i32_1 = arith.constant 0 : i32
    return %c0_i32, %c0_i32_0 : i32, i32
  }
  func.func @transform_5(%arg0: i32) -> (i32, i32) {
    %c0_i32 = arith.constant 0 : i32
    %c0_i32_0 = arith.constant 0 : i32
    %c0_i32_1 = arith.constant 0 : i32
    return %c0_i32, %c0_i32_0 : i32, i32
  }
  func.func @transform_6(%arg0: i32) -> (i32, i32) {
    %c0_i32 = arith.constant 0 : i32
    %c0_i32_0 = arith.constant 0 : i32
    %c0_i32_1 = arith.constant 0 : i32
    return %c0_i32, %c0_i32_0 : i32, i32
  }
}

</mosaic_0001>

<bundles_post_ra>
// kernel: custom_conv_forward.1
= control target key start
LH: loop header
LB: loop body
LE: loop exit
PB: predicated region body
PF: predicated region fallthrough
CT: control target
= control target key end

     0   :  { %v518_v0 = vmov 0.0   ;;  %vm519_vm0 = vmmov 0   ;;  %vm49_vm1 = vcmask 261120   ;;  %vm107_vm2 = vcmask 130048   ;;  %s639_s2 = inlined_call_operand.vmem [shape: bf16[3,32,32], index: 2, kind: input, shape index: {}]   ;;  %s640_s0 = inlined_call_operand.vmem [shape: bf16[16,32], index: 0, kind: input, shape index: {}]   ;;  %s641_s1 = inlined_call_operand.vmem [shape: bf16[16,16], index: 1, kind: input, shape index: {}]   ;;  %s642_s3 = inlined_call_operand.vmem [shape: f32[3,1,32], index: 3, kind: input, shape index: {}]   ;;  %s643_s4 = inlined_call_operand.vmem [shape: bf16[32,128], index: 4, kind: input, shape index: {}]   ;;  %s644_s5 = inlined_call_operand.vmem [shape: f32[1,128], index: 5, kind: input, shape index: {}]   ;;  %s645_s6 = inlined_call_operand.vmem [shape: f32[16,128], index: 6, kind: output, shape index: {}]  }
   0x1   :  { %462 = vmatprep.subr.bf16.mxu0 %v518_v0  ;;  %v508_v1 = vld [vmem:[%s639_s2 + $0x8] sm:$0xff]   ;;  %466 = vmatprep.mubr.msk.bf16.mxu0 %vm519_vm0, %v518_v0  ;;  %v509_v2 = vld [vmem:[%s639_s2] sm:$0xff]   ;;  %v512_v10 = vld [vmem:[%s639_s2 + $0x18] sm:$0xff]  }
   0x2   :  { %470 = vmatprep.subr.bf16.mxu1 %v518_v0  ;;  %472 = vmatprep.mubr.msk.bf16.mxu1 %vm519_vm0, %v518_v0  ;;  %v510_v3 = vld [vmem:[%s640_s0] sm:$0xff]   ;;  %v513_v11 = vld [vmem:[%s639_s2 + $0x10] sm:$0xff]   ;;  %v514_v27 = vld [vmem:[%s639_s2 + $0x28] sm:$0xff]  }
   0x3   :  { %463 = vmatpush3.bf16.msra.mxu0 %v508_v1  ;;  %v511_v9 = vld [vmem:[%s641_s1] sm:$0xff]   ;;  %v516_v39 = vld [vmem:[%s643_s4 + $0x8] sm:$0xff]  }
   0x4   :  { %464 = vmatprep.subr.bf16.mxu0 %v518_v0  ;;  %v420_v12 = vld [vmem:[%s642_s3] ss:$0 sm:$0xff]  ;;  %v431_v29 = vld [vmem:[%s642_s3 + $0x1] ss:$0 sm:$0xff]  ;;  %v438_v41 = vld [vmem:[%s642_s3 + $0x2] ss:$0 sm:$0xff] }
   0x5   :  { %v515_v28 = vld [vmem:[%s639_s2 + $0x20] sm:$0xff]  }
   0x6   :  { %v517_v40 = vld [vmem:[%s643_s4] sm:$0xff]  }
   0x7   :  { %465 = vmatpush3.bf16.msra.mxu0 %v509_v2  ;;  %v442_v51 = vld [vmem:[%s644_s5] ss:$0 sm:$0xff] }
   0x8   :  { %484 = vmatprep.subr.bf16.mxu0 %v518_v0 }
   0xa   :  { %467 = vmatmul.mubr.msk.bf16.vlgmr.msra.gmra.mxu0 %vm49_vm1, %v510_v3 }
   0xb   :  { %486 = vmatprep.mubr.msk.bf16.mxu0 %vm519_vm0, %v518_v0 }
  0xca   :  { %v87_v4 = vpop.f32.mrf.mxu0 }
  0xcc   :  { %v468_v5 = vpop.f32.mrf.mxu0 }
  0xce   :  { %v90_v6 = vpop.f32.mrf.mxu0 }
  0xcf   :  { %v94_v7 = vpack.c.bf16 %v90_v6, %v87_v4 }
  0xd0   :  { %v469_v8 = vpop.f32.mrf.mxu0 }
  0xd1   :  { %471 = vmatpush3.bf16.msra.mxu1 %v94_v7 }
  0xd2   :  { %476 = vmatprep.subr.bf16.mxu1 %v518_v0 }
  0xd4   :  { %473 = vmatmul.mubr.msk.bf16.vlgmr.msra.gmra.mxu1 %vm107_vm2, %v511_v9 }
  0xd5   :  { %480 = vmatprep.mubr.msk.bf16.mxu1 %vm519_vm0, %v518_v0  ;;  %477 = vmatpush3.bf16.msra.mxu1 %v512_v10 }
  0xd6   :  { %478 = vmatprep.subr.bf16.mxu1 %v518_v0 }
  0xd9   :  { %479 = vmatpush3.bf16.msra.mxu1 %v513_v11 }
  0xda   :  { %490 = vmatprep.subr.bf16.mxu1 %v518_v0 }
 0x194   :  { %v145_v13 = vpop.f32.mrf.mxu1 }
 0x195   :  { %v146_v15 = vadd.f32 %v420_v12, %v145_v13 }
 0x196   :  { %v474_v14 = vpop.f32.mrf.mxu1 }
 0x197   :  { %v152_v19 = vmax.f32 %v146_v15, 0.0 }
 0x198   :  { %v148_v16 = vpop.f32.mrf.mxu1 }
 0x199   :  { %v149_v17 = vadd.f32 %v420_v12, %v148_v16 }
 0x19a   :  { %v475_v18 = vpop.f32.mrf.mxu1 }
 0x19b   :  { %v153_v20 = vmax.f32 %v149_v17, 0.0 }
 0x19d   :  { %v154_v21 = vpack.c.bf16 %v153_v20, %v152_v19 }
 0x19f   :  { %481 = vmatmul.mubr.msk.bf16.vlgmr.msra.gmra.mxu1 %vm49_vm1, %v154_v21 }
 0x1a0   :  { %494 = vmatprep.mubr.msk.bf16.mxu1 %vm519_vm0, %v518_v0  ;;  %491 = vmatpush3.bf16.msra.mxu1 %v514_v27 }
 0x1a1   :  { %492 = vmatprep.subr.bf16.mxu1 %v518_v0 }
 0x1a4   :  { %493 = vmatpush3.bf16.msra.mxu1 %v515_v28 }
 0x25f   :  { %v209_v22 = vpop.f32.mrf.mxu1 }
 0x261   :  { %v482_v23 = vpop.f32.mrf.mxu1 }
 0x263   :  { %v212_v24 = vpop.f32.mrf.mxu1 }
 0x264   :  { %v216_v25 = vpack.c.bf16 %v212_v24, %v209_v22 }
 0x265   :  { %v483_v26 = vpop.f32.mrf.mxu1 }
 0x266   :  { %485 = vmatpush3.bf16.msra.mxu0 %v216_v25 }
 0x267   :  { %498 = vmatprep.subr.bf16.mxu0 %v518_v0 }
 0x269   :  { %487 = vmatmul.mubr.msk.bf16.vlgmr.msra.gmra.mxu0 %vm107_vm2, %v511_v9 }
 0x26a   :  { %502 = vmatprep.mubr.msk.bf16.mxu0 %vm519_vm0, %v518_v0  ;;  %499 = vmatpush3.bf16.msra.mxu0 %v516_v39 }
 0x26b   :  { %500 = vmatprep.subr.bf16.mxu0 %v518_v0 }
 0x26e   :  { %501 = vmatpush3.bf16.msra.mxu0 %v517_v40 }
 0x329   :  { %v259_v30 = vpop.f32.mrf.mxu0 }
 0x32a   :  { %v260_v32 = vadd.f32 %v431_v29, %v259_v30 }
 0x32b   :  { %v488_v31 = vpop.f32.mrf.mxu0 }
 0x32c   :  { %v266_v36 = vmax.f32 %v260_v32, 0.0 }
 0x32d   :  { %v262_v33 = vpop.f32.mrf.mxu0 }
 0x32e   :  { %v263_v34 = vadd.f32 %v431_v29, %v262_v33 }
 0x32f   :  { %v489_v35 = vpop.f32.mrf.mxu0 }
 0x330   :  { %v267_v37 = vmax.f32 %v263_v34, 0.0 }
 0x332   :  { %v268_v38 = vpack.c.bf16 %v267_v37, %v266_v36 }
 0x334   :  { %495 = vmatmul.mubr.msk.bf16.vlgmr.msra.gmra.mxu1 %vm49_vm1, %v268_v38 }
 0x3f4   :  { %v331_v42 = vpop.f32.mrf.mxu1 }
 0x3f5   :  { %v332_v44 = vadd.f32 %v438_v41, %v331_v42 }
 0x3f6   :  { %v496_v43 = vpop.f32.mrf.mxu1 }
 0x3f7   :  { %v338_v48 = vmax.f32 %v332_v44, 0.0 }
 0x3f8   :  { %v334_v45 = vpop.f32.mrf.mxu1 }
 0x3f9   :  { %v335_v46 = vadd.f32 %v438_v41, %v334_v45 }
 0x3fa   :  { %v497_v47 = vpop.f32.mrf.mxu1 }
 0x3fb   :  { %v339_v49 = vmax.f32 %v335_v46, 0.0 }
 0x3fd   :  { %v340_v50 = vpack.c.bf16 %v339_v49, %v338_v48 }
 0x3ff   :  { %503 = vmatmul.mubr.msk.bf16.vlgmr.msra.gmra.mxu0 %vm49_vm1, %v340_v50 }
 0x4bf   :  { %v401_v52 = vpop.f32.mrf.mxu0 }
 0x4c0   :  { %v402_v53 = vadd.f32 %v442_v51, %v401_v52 }
 0x4c1   :  { %v504_v54 = vpop.f32.mrf.mxu0 }
 0x4c2   :  { %408 = vst [vmem:[%s645_s6] sm:$0xff] %v402_v53 }
 0x4c3   :  { %410 = vst.msk [vmem:[%s645_s6] sm:$0xff] %vm49_vm1, %v266_v36  ;;  %v404_v55 = vpop.f32.mrf.mxu0 }
 0x4c4   :  { %v405_v56 = vadd.f32 %v442_v51, %v404_v55 }
 0x4c5   :  { %v505_v57 = vpop.f32.mrf.mxu0 }
 0x4c6   :  { %409 = vst [vmem:[%s645_s6 + $0x8] sm:$0xff] %v405_v56 }
 0x4c7   :  { %411 = vst.msk [vmem:[%s645_s6 + $0x8] sm:$0xff] %vm49_vm1, %v267_v37 }

</bundles_post_ra>
